<compile_context>
chip_gen: v6e
topology: v6e:2x2x1
jax: 0.10.0
libtpu: 0.0.40
codegen_flags: <defaults>
</compile_context>

<pallas_src>
import jax
import jax.numpy as jnp
from jax import lax
from jax.experimental import pallas as pl
from jax.experimental.pallas import tpu as pltpu


def cbow_kernel(ids_ref, lens_ref, table_ref, out_ref, rows_ref):
    # ids_ref  : SMEM int32 [B_pad * S]  (scalar prefetch, row-major token ids)
    # lens_ref : SMEM int32 [B_pad]      (scalar prefetch)
    # table_ref: VMEM [V, D] native dtype (resident: constant block index)
    # out_ref  : VMEM [TB, D] f32        (one batch tile of the output)
    # rows_ref : VMEM scratch [TB*S, D]  native dtype (staged gathered rows)
    TB, D = out_ref.shape
    S = rows_ref.shape[0] // TB
    tile = pl.program_id(0)
    base = tile * (TB * S)

    # Stage all TB*S embedding rows for this batch tile (VMEM -> VMEM gather;
    # no HBM traffic since the table block is resident).
    @pl.loop(0, TB * S)
    def _(t):
        tok = ids_ref[base + t]
        rows_ref[pl.ds(t, 1), :] = table_ref[pl.ds(tok, 1), :]

    rows = rows_ref[...].astype(jnp.float32)             # [TB*S, D], cast in-kernel
    pos = lax.broadcasted_iota(jnp.int32, (S, 1), 0)     # [S, 1] positions

    # Weighted reduction in one pass per batch row; single dense (TB, D) store.
    out_rows = []
    for b in range(TB):                                  # static unroll (TB == 8)
        ln = lens_ref[tile * TB + b]                     # scalar int32 from SMEM
        lnf = jnp.maximum(ln, 1).astype(jnp.float32)
        wb = (pos < ln).astype(jnp.float32) / lnf        # [S, 1] = mask / len
        seg = rows[b * S:(b + 1) * S, :]                 # [S, D] static slice
        out_rows.append(jnp.sum(seg * wb, axis=0, keepdims=True))   # [1, D]
    out_ref[...] = jnp.concatenate(out_rows, axis=0)     # [TB, D]


def cbow_encoder(x_ids, x_lens, embed_table, *, batch_tile=8):
    """x_ids: [B, S] int, x_lens: [B] int, embed_table: [V, D] -> [B, D] f32."""
    B, S = x_ids.shape
    V, D = embed_table.shape
    TB = batch_tile
    n_tiles = -(-B // TB)
    B_pad = n_tiles * TB

    # Clamp ids into range so the VMEM gather can never go out of bounds
    # (nn.Embedding would raise on OOB ids; documented semantic divergence).
    ids = jnp.clip(x_ids.astype(jnp.int32), 0, V - 1)
    lens = x_lens.astype(jnp.int32)
    if B_pad != B:
        ids = jnp.pad(ids, ((0, B_pad - B), (0, 0)))     # pad ids -> row 0, weight 0
        lens = jnp.pad(lens, (0, B_pad - B))             # len 0   -> zero output row
    ids_flat = ids.reshape(B_pad * S)

    # VMEM budget check (sized against v7x's 64 MiB physical VMEM).
    itemsize = jnp.dtype(embed_table.dtype).itemsize
    table_bytes = V * D * itemsize
    scratch_bytes = TB * S * D * itemsize
    vmem_needed = 2 * table_bytes + scratch_bytes + 2 * TB * D * 4 + (1 << 20)
    vmem_budget = 44 * 2**20
    if vmem_needed > vmem_budget:
        # TODO(synk): add a manual double-buffered HBM row-gather path
        # (memory_space=pl.ANY + make_async_copy ring, 4-8 DMAs in flight)
        # for embedding tables that do not fit in VMEM.
        raise NotImplementedError("embedding table too large for VMEM-resident kernel")
    vmem_limit = int(min(max(vmem_needed, 16 * 2**20), vmem_budget))

    out = pl.pallas_call(
        cbow_kernel,
        out_shape=jax.ShapeDtypeStruct((B_pad, D), jnp.float32),
        grid_spec=pltpu.PrefetchScalarGridSpec(
            num_scalar_prefetch=2,                       # ids_flat, lens -> SMEM
            grid=(n_tiles,),                             # one step per batch tile
            in_specs=[
                # Whole embedding table resident in VMEM, native dtype.
                pl.BlockSpec((V, D), lambda i, ids, lens: (0, 0)),
            ],
            out_specs=pl.BlockSpec((TB, D), lambda i, ids, lens: (i, 0)),
            scratch_shapes=[pltpu.VMEM((TB * S, D), embed_table.dtype)],
        ),
        compiler_params=pltpu.CompilerParams(
            dimension_semantics=("parallel",),
            vmem_limit_bytes=vmem_limit),
    )(ids_flat, lens, embed_table)

    return out[:B]


def cbow_reference(x_ids, x_lens, embed_table):
    emb = embed_table[x_ids].astype(jnp.float32)         # [B, S, D]
    _, S = x_ids.shape
    pos = jnp.arange(S, dtype=jnp.int32)[None, :]
    mask = (pos < x_lens[:, None]).astype(jnp.float32)
    w = mask / jnp.maximum(x_lens[:, None], 1).astype(jnp.float32)
    return jnp.einsum("bs,bsd->bd", w, emb)


if __name__ == "__main__":
    B, S, V, D = 2, 8, 64, 32

    key = jax.random.PRNGKey(0)
    k_ids, k_lens, k_emb = jax.random.split(key, 3)

    x_ids = jax.random.randint(k_ids, (B, S), 0, V, dtype=jnp.int32)
    x_lens = jax.random.randint(k_lens, (B,), 1, S + 1, dtype=jnp.int32)
    # Deterministic "pretrained" embedding table (synthetic, not a checkpoint).
    embed_table = jax.random.normal(k_emb, (V, D), dtype=jnp.float32)

    out = cbow_encoder(x_ids, x_lens, embed_table)
    out = jax.block_until_ready(out)

    ref = cbow_reference(x_ids, x_lens, embed_table)
    assert out.shape == (B, D)
    assert jnp.allclose(out, ref, atol=1e-5, rtol=1e-5)

    print("KERNEL_OK")
</pallas_src>

<mosaic_0001>
module attributes {stable_mosaic.version = 11 : i64} {
  func.func @cbow_kernel(%arg0: i32, %arg1: memref<64xi32, #tpu.memory_space<smem>>, %arg2: memref<8xi32, #tpu.memory_space<smem>>, %arg3: memref<64x32xf32, #tpu.memory_space<vmem>>, %arg4: memref<8x32xf32, #tpu.memory_space<vmem>>, %arg5: memref<64x32xf32, #tpu.memory_space<vmem>>) attributes {dimension_semantics = [#tpu.dimension_semantics<parallel>], iteration_bounds = array<i64: 1>, scalar_prefetch = 2 : i64, scratch_operands = 1 : i64, tpu.core_type = #tpu.core_type<tc>, window_params = [{pipeline_mode = #tpu.pipeline_mode<synchronous>, transform_indices = @transform_0, window_bounds = array<i64: 64, 32>}, {transform_indices = @transform_1, window_bounds = array<i64: 8, 32>}]} {
    %c64_i32 = arith.constant 64 : i32
    %0 = arith.muli %arg0, %c64_i32 : i32
    %c0_i32 = arith.constant 0 : i32
    %c64_i32_0 = arith.constant 64 : i32
    %1 = arith.addi %c0_i32, %c64_i32_0 : i32
    %c1_i32 = arith.constant 1 : i32
    scf.for %arg6 = %c0_i32 to %1 step %c1_i32  : i32 {
      %c1_i32_29 = arith.constant 1 : i32
      %142 = arith.muli %arg6, %c1_i32_29 : i32
      %c0_i32_30 = arith.constant 0 : i32
      %143 = arith.addi %c0_i32_30, %142 : i32
      %144 = arith.addi %0, %143 : i32
      %145 = arith.index_cast %144 : i32 to index
      %146 = memref.load %arg1[%145] : memref<64xi32, #tpu.memory_space<smem>>
      %147 = arith.index_cast %146 : i32 to index
      %c0_31 = arith.constant 0 : index
      %148 = vector.load %arg3[%147, %c0_31] : memref<64x32xf32, #tpu.memory_space<vmem>>, vector<1x32xf32>
      %149 = arith.index_cast %143 : i32 to index
      %c0_32 = arith.constant 0 : index
      %150 = vector.load %arg5[%149, %c0_32] : memref<64x32xf32, #tpu.memory_space<vmem>>, vector<1x32xf32>
      tpu.vector_store %arg5[%149, %c0_32], %148 {strides = array<i32>} : memref<64x32xf32, #tpu.memory_space<vmem>>, vector<1x32xf32>,
    }
    %c64_i32_1 = arith.constant 64 : i32
    %c0 = arith.constant 0 : index
    %c0_2 = arith.constant 0 : index
    %2 = vector.load %arg5[%c0, %c0_2] : memref<64x32xf32, #tpu.memory_space<vmem>>, vector<64x32xf32>
    %3 = tpu.iota {dimensions = array<i32: 0>} : vector<8x1xi32>
    %c8_i32 = arith.constant 8 : i32
    %4 = arith.muli %arg0, %c8_i32 : i32
    %c0_i32_3 = arith.constant 0 : i32
    %5 = arith.addi %4, %c0_i32_3 : i32
    %6 = arith.index_cast %5 : i32 to index
    %7 = memref.load %arg2[%6] : memref<8xi32, #tpu.memory_space<smem>>
    %c1_i32_4 = arith.constant 1 : i32
    %8 = arith.maxsi %7, %c1_i32_4 : i32
    %9 = arith.sitofp %8 : i32 to f32
    %10 = vector.broadcast %7 : i32 to vector<8x1xi32>
    %11 = arith.cmpi slt, %3, %10 : vector<8x1xi32>
    %12 = arith.extui %11 : vector<8x1xi1> to vector<8x1xi32>
    %13 = arith.sitofp %12 : vector<8x1xi32> to vector<8x1xf32>
    %14 = vector.broadcast %9 : f32 to vector<8x1xf32>
    %15 = arith.divf %13, %14 : vector<8x1xf32>
    %16 = vector.extract_strided_slice %2 {offsets = [0, 0], sizes = [8, 32], strides = [1, 1]} : vector<64x32xf32> to vector<8x32xf32>
    %17 = vector.broadcast %15 : vector<8x1xf32> to vector<8x32xf32>
    %18 = arith.mulf %16, %17 : vector<8x32xf32>
    %cst = arith.constant dense<0.000000e+00> : vector<32xf32>
    %19 = vector.multi_reduction <add>, %18, %cst [0] : vector<8x32xf32> to vector<32xf32>
    %20 = vector.shape_cast %19 : vector<32xf32> to vector<1x32xf32>
    %c8_i32_5 = arith.constant 8 : i32
    %21 = arith.muli %arg0, %c8_i32_5 : i32
    %c1_i32_6 = arith.constant 1 : i32
    %22 = arith.addi %21, %c1_i32_6 : i32
    %23 = arith.index_cast %22 : i32 to index
    %24 = memref.load %arg2[%23] : memref<8xi32, #tpu.memory_space<smem>>
    %c1_i32_7 = arith.constant 1 : i32
    %25 = arith.maxsi %24, %c1_i32_7 : i32
    %26 = arith.sitofp %25 : i32 to f32
    %27 = vector.broadcast %24 : i32 to vector<8x1xi32>
    %28 = arith.cmpi slt, %3, %27 : vector<8x1xi32>
    %29 = arith.extui %28 : vector<8x1xi1> to vector<8x1xi32>
    %30 = arith.sitofp %29 : vector<8x1xi32> to vector<8x1xf32>
    %31 = vector.broadcast %26 : f32 to vector<8x1xf32>
    %32 = arith.divf %30, %31 : vector<8x1xf32>
    %33 = vector.extract_strided_slice %2 {offsets = [8, 0], sizes = [8, 32], strides = [1, 1]} : vector<64x32xf32> to vector<8x32xf32>
    %34 = vector.broadcast %32 : vector<8x1xf32> to vector<8x32xf32>
    %35 = arith.mulf %33, %34 : vector<8x32xf32>
    %cst_8 = arith.constant dense<0.000000e+00> : vector<32xf32>
    %36 = vector.multi_reduction <add>, %35, %cst_8 [0] : vector<8x32xf32> to vector<32xf32>
    %37 = vector.shape_cast %36 : vector<32xf32> to vector<1x32xf32>
    %c8_i32_9 = arith.constant 8 : i32
    %38 = arith.muli %arg0, %c8_i32_9 : i32
    %c2_i32 = arith.constant 2 : i32
    %39 = arith.addi %38, %c2_i32 : i32
    %40 = arith.index_cast %39 : i32 to index
    %41 = memref.load %arg2[%40] : memref<8xi32, #tpu.memory_space<smem>>
    %c1_i32_10 = arith.constant 1 : i32
    %42 = arith.maxsi %41, %c1_i32_10 : i32
    %43 = arith.sitofp %42 : i32 to f32
    %44 = vector.broadcast %41 : i32 to vector<8x1xi32>
    %45 = arith.cmpi slt, %3, %44 : vector<8x1xi32>
    %46 = arith.extui %45 : vector<8x1xi1> to vector<8x1xi32>
    %47 = arith.sitofp %46 : vector<8x1xi32> to vector<8x1xf32>
    %48 = vector.broadcast %43 : f32 to vector<8x1xf32>
    %49 = arith.divf %47, %48 : vector<8x1xf32>
    %50 = vector.extract_strided_slice %2 {offsets = [16, 0], sizes = [8, 32], strides = [1, 1]} : vector<64x32xf32> to vector<8x32xf32>
    %51 = vector.broadcast %49 : vector<8x1xf32> to vector<8x32xf32>
    %52 = arith.mulf %50, %51 : vector<8x32xf32>
    %cst_11 = arith.constant dense<0.000000e+00> : vector<32xf32>
    %53 = vector.multi_reduction <add>, %52, %cst_11 [0] : vector<8x32xf32> to vector<32xf32>
    %54 = vector.shape_cast %53 : vector<32xf32> to vector<1x32xf32>
    %c8_i32_12 = arith.constant 8 : i32
    %55 = arith.muli %arg0, %c8_i32_12 : i32
    %c3_i32 = arith.constant 3 : i32
    %56 = arith.addi %55, %c3_i32 : i32
    %57 = arith.index_cast %56 : i32 to index
    %58 = memref.load %arg2[%57] : memref<8xi32, #tpu.memory_space<smem>>
    %c1_i32_13 = arith.constant 1 : i32
    %59 = arith.maxsi %58, %c1_i32_13 : i32
    %60 = arith.sitofp %59 : i32 to f32
    %61 = vector.broadcast %58 : i32 to vector<8x1xi32>
    %62 = arith.cmpi slt, %3, %61 : vector<8x1xi32>
    %63 = arith.extui %62 : vector<8x1xi1> to vector<8x1xi32>
    %64 = arith.sitofp %63 : vector<8x1xi32> to vector<8x1xf32>
    %65 = vector.broadcast %60 : f32 to vector<8x1xf32>
    %66 = arith.divf %64, %65 : vector<8x1xf32>
    %67 = vector.extract_strided_slice %2 {offsets = [24, 0], sizes = [8, 32], strides = [1, 1]} : vector<64x32xf32> to vector<8x32xf32>
    %68 = vector.broadcast %66 : vector<8x1xf32> to vector<8x32xf32>
    %69 = arith.mulf %67, %68 : vector<8x32xf32>
    %cst_14 = arith.constant dense<0.000000e+00> : vector<32xf32>
    %70 = vector.multi_reduction <add>, %69, %cst_14 [0] : vector<8x32xf32> to vector<32xf32>
    %71 = vector.shape_cast %70 : vector<32xf32> to vector<1x32xf32>
    %c8_i32_15 = arith.constant 8 : i32
    %72 = arith.muli %arg0, %c8_i32_15 : i32
    %c4_i32 = arith.constant 4 : i32
    %73 = arith.addi %72, %c4_i32 : i32
    %74 = arith.index_cast %73 : i32 to index
    %75 = memref.load %arg2[%74] : memref<8xi32, #tpu.memory_space<smem>>
    %c1_i32_16 = arith.constant 1 : i32
    %76 = arith.maxsi %75, %c1_i32_16 : i32
    %77 = arith.sitofp %76 : i32 to f32
    %78 = vector.broadcast %75 : i32 to vector<8x1xi32>
    %79 = arith.cmpi slt, %3, %78 : vector<8x1xi32>
    %80 = arith.extui %79 : vector<8x1xi1> to vector<8x1xi32>
    %81 = arith.sitofp %80 : vector<8x1xi32> to vector<8x1xf32>
    %82 = vector.broadcast %77 : f32 to vector<8x1xf32>
    %83 = arith.divf %81, %82 : vector<8x1xf32>
    %84 = vector.extract_strided_slice %2 {offsets = [32, 0], sizes = [8, 32], strides = [1, 1]} : vector<64x32xf32> to vector<8x32xf32>
    %85 = vector.broadcast %83 : vector<8x1xf32> to vector<8x32xf32>
    %86 = arith.mulf %84, %85 : vector<8x32xf32>
    %cst_17 = arith.constant dense<0.000000e+00> : vector<32xf32>
    %87 = vector.multi_reduction <add>, %86, %cst_17 [0] : vector<8x32xf32> to vector<32xf32>
    %88 = vector.shape_cast %87 : vector<32xf32> to vector<1x32xf32>
    %c8_i32_18 = arith.constant 8 : i32
    %89 = arith.muli %arg0, %c8_i32_18 : i32
    %c5_i32 = arith.constant 5 : i32
    %90 = arith.addi %89, %c5_i32 : i32
    %91 = arith.index_cast %90 : i32 to index
    %92 = memref.load %arg2[%91] : memref<8xi32, #tpu.memory_space<smem>>
    %c1_i32_19 = arith.constant 1 : i32
    %93 = arith.maxsi %92, %c1_i32_19 : i32
    %94 = arith.sitofp %93 : i32 to f32
    %95 = vector.broadcast %92 : i32 to vector<8x1xi32>
    %96 = arith.cmpi slt, %3, %95 : vector<8x1xi32>
    %97 = arith.extui %96 : vector<8x1xi1> to vector<8x1xi32>
    %98 = arith.sitofp %97 : vector<8x1xi32> to vector<8x1xf32>
    %99 = vector.broadcast %94 : f32 to vector<8x1xf32>
    %100 = arith.divf %98, %99 : vector<8x1xf32>
    %101 = vector.extract_strided_slice %2 {offsets = [40, 0], sizes = [8, 32], strides = [1, 1]} : vector<64x32xf32> to vector<8x32xf32>
    %102 = vector.broadcast %100 : vector<8x1xf32> to vector<8x32xf32>
    %103 = arith.mulf %101, %102 : vector<8x32xf32>
    %cst_20 = arith.constant dense<0.000000e+00> : vector<32xf32>
    %104 = vector.multi_reduction <add>, %103, %cst_20 [0] : vector<8x32xf32> to vector<32xf32>
    %105 = vector.shape_cast %104 : vector<32xf32> to vector<1x32xf32>
    %c8_i32_21 = arith.constant 8 : i32
    %106 = arith.muli %arg0, %c8_i32_21 : i32
    %c6_i32 = arith.constant 6 : i32
    %107 = arith.addi %106, %c6_i32 : i32
    %108 = arith.index_cast %107 : i32 to index
    %109 = memref.load %arg2[%108] : memref<8xi32, #tpu.memory_space<smem>>
    %c1_i32_22 = arith.constant 1 : i32
    %110 = arith.maxsi %109, %c1_i32_22 : i32
    %111 = arith.sitofp %110 : i32 to f32
    %112 = vector.broadcast %109 : i32 to vector<8x1xi32>
    %113 = arith.cmpi slt, %3, %112 : vector<8x1xi32>
    %114 = arith.extui %113 : vector<8x1xi1> to vector<8x1xi32>
    %115 = arith.sitofp %114 : vector<8x1xi32> to vector<8x1xf32>
    %116 = vector.broadcast %111 : f32 to vector<8x1xf32>
    %117 = arith.divf %115, %116 : vector<8x1xf32>
    %118 = vector.extract_strided_slice %2 {offsets = [48, 0], sizes = [8, 32], strides = [1, 1]} : vector<64x32xf32> to vector<8x32xf32>
    %119 = vector.broadcast %117 : vector<8x1xf32> to vector<8x32xf32>
    %120 = arith.mulf %118, %119 : vector<8x32xf32>
    %cst_23 = arith.constant dense<0.000000e+00> : vector<32xf32>
    %121 = vector.multi_reduction <add>, %120, %cst_23 [0] : vector<8x32xf32> to vector<32xf32>
    %122 = vector.shape_cast %121 : vector<32xf32> to vector<1x32xf32>
    %c8_i32_24 = arith.constant 8 : i32
    %123 = arith.muli %arg0, %c8_i32_24 : i32
    %c7_i32 = arith.constant 7 : i32
    %124 = arith.addi %123, %c7_i32 : i32
    %125 = arith.index_cast %124 : i32 to index
    %126 = memref.load %arg2[%125] : memref<8xi32, #tpu.memory_space<smem>>
    %c1_i32_25 = arith.constant 1 : i32
    %127 = arith.maxsi %126, %c1_i32_25 : i32
    %128 = arith.sitofp %127 : i32 to f32
    %129 = vector.broadcast %126 : i32 to vector<8x1xi32>
    %130 = arith.cmpi slt, %3, %129 : vector<8x1xi32>
    %131 = arith.extui %130 : vector<8x1xi1> to vector<8x1xi32>
    %132 = arith.sitofp %131 : vector<8x1xi32> to vector<8x1xf32>
    %133 = vector.broadcast %128 : f32 to vector<8x1xf32>
    %134 = arith.divf %132, %133 : vector<8x1xf32>
    %135 = vector.extract_strided_slice %2 {offsets = [56, 0], sizes = [8, 32], strides = [1, 1]} : vector<64x32xf32> to vector<8x32xf32>
    %136 = vector.broadcast %134 : vector<8x1xf32> to vector<8x32xf32>
    %137 = arith.mulf %135, %136 : vector<8x32xf32>
    %cst_26 = arith.constant dense<0.000000e+00> : vector<32xf32>
    %138 = vector.multi_reduction <add>, %137, %cst_26 [0] : vector<8x32xf32> to vector<32xf32>
    %139 = vector.shape_cast %138 : vector<32xf32> to vector<1x32xf32>
    %140 = tpu.concatenate %20, %37, %54, %71, %88, %105, %122, %139 in 0 : vector<1x32xf32>, vector<1x32xf32>, vector<1x32xf32>, vector<1x32xf32>, vector<1x32xf32>, vector<1x32xf32>, vector<1x32xf32>, vector<1x32xf32> -> vector<8x32xf32>
    %c0_27 = arith.constant 0 : index
    %c0_28 = arith.constant 0 : index
    %141 = vector.load %arg4[%c0_27, %c0_28] : memref<8x32xf32, #tpu.memory_space<vmem>>, vector<8x32xf32>
    tpu.vector_store %arg4[%c0_27, %c0_28], %140 {strides = array<i32>} : memref<8x32xf32, #tpu.memory_space<vmem>>, vector<8x32xf32>,
    return
  }
  func.func @transform_0(%arg0: i32, %arg1: memref<64xi32, #tpu.memory_space<smem>>, %arg2: memref<8xi32, #tpu.memory_space<smem>>) -> (i32, i32) {
    %c0_i32 = arith.constant 0 : i32
    %c0_i32_0 = arith.constant 0 : i32
    %c0_i32_1 = arith.constant 0 : i32
    return %c0_i32, %c0_i32_0 : i32, i32
  }
  func.func @transform_1(%arg0: i32, %arg1: memref<64xi32, #tpu.memory_space<smem>>, %arg2: memref<8xi32, #tpu.memory_space<smem>>) -> (i32, i32) {
    %c0_i32 = arith.constant 0 : i32
    %c0_i32_0 = arith.constant 0 : i32
    return %arg0, %c0_i32 : i32, i32
  }
}

</mosaic_0001>

<bundles_post_ra>
// kernel: tpu_custom_call.1
= control target key start
LH: loop header
LB: loop body
LE: loop exit
PB: predicated region body
PF: predicated region fallthrough
CT: control target
= control target key end

     0   :  { %s446_s0 = inlined_call_operand.vmem [shape: s32[64], index: 0, kind: input, shape index: {}]   ;;  %s447_s2 = inlined_call_operand.vmem [shape: f32[64,32], index: 2, kind: input, shape index: {}]   ;;  %s448_s3 = inlined_call_operand.hbm [shape: f32[8,32], index: 3, kind: output, shape index: {}]   ;;  %s449_s1 = inlined_call_operand.vmem [shape: s32[8], index: 1, kind: input, shape index: {}]  }
   0x1   :  { %s8_s14 = sshll.u32 %s446_s0, 4  ;;  %s12_s17 = sshll.u32 %s449_s1, 4  ;;  %s9_s14 = int_to_ptr.vmem [resolvable:$true] %s8_s14  ;;  %s13_s17 = int_to_ptr.vmem [resolvable:$true] %s12_s17 }
   0x2   :  { %s285_s18 = scalar_lea.vmem %s9_s14, 16  ;;  %p290_p1 = scmp.lt.s32.totalorder %s9_s14, %s9_s14 }
   0x3   :  { %p286_p0 = scmp.ne.s32.totalorder %s9_s14, %s285_s18  ;;  %p291_p2 = scmp.lt.s32.totalorder %s285_s18, %s285_s18 }
   0x5   :  { %p292_p3 = por %p291_p2, %p290_p1 }
   0x7   :  { %p293_p4 = pnand %p292_p3, %p286_p0 }
   0x9   :  { %296 = shalt.err (!%p293_p4)  }
   0xa   :  { %s341_s19 = smov [#allocation4]   ;;  %s297_s20 = scalar_lea.vmem %s13_s17, 16 }
   0xb   :  { %11 = dma.vmem_to_smem %s9_s14, 16, %s341_s19, [#allocation3] }
   0xc   :  { %p298_p5 = scmp.ne.s32.totalorder %s13_s17, %s297_s20  ;;  %p302_p6 = scmp.lt.s32.totalorder %s13_s17, %s13_s17 }
   0xd   :  { %p303_p7 = scmp.lt.s32.totalorder %s297_s20, %s297_s20 }
   0xf   :  { %p304_p8 = por %p303_p7, %p302_p6 }
  0x11   :  { %p305_p9 = pnand %p304_p8, %p298_p5 }
  0x13   :  { %308 = shalt.err (!%p305_p9)  }
  0x14   :  { %s342_s0 = smov [#allocation5]  }
  0x15   :  { %15 = dma.vmem_to_smem %s13_s17, 16, %s342_s0, [#allocation3] }
  0x16   :  { %333 = dma.done.wait [#allocation3], 32 }
  0x17   :  { %334 = vsyncadd [#allocation3], 4294967264 }
  0x18   :  { %17 = sfence }
  0x19   :  { %18 = vsyncpa [#allocation7], 0  ;;  %s337_s1 = smov 0  }
  0x1a LB: > { %s29_s21 = sld [smem:[#allocation4 + %s339_s1]]  ;;  %vm33_vm0 = vcmask 253952   ;;  %s32_s25 = scalar_lea.vmem [#allocation2], %s339_s1  ;;  %s339_s1 = sphi %s337_s1, %s27_s1  }
  0x1b   : > { %s27_s1 = sadd.s32 1, %s339_s1  }
  0x1c   : > { %p24_p10 = scmp.ge.s32.totalorder %s27_s1, 64  }
  0x1d   :  { %s374_s26 = sld [smem:[#allocation5]] (%p24_p10)  ;;  %v43_v2 = vlaneseq (%p24_p10)  ;;  %v343_v13 = vmov (%p24_p10), 0.0   ;;  %vm58_vm5 = vcmask (%p24_p10), 261120   ;;  %vm206_vm9 = vcmask (%p24_p10), 1040384   ;;  %s344_s1 = smov (%p24_p10), [#allocation6]  }
  0x1e   :  { %26 = sbr.rel (!%p24_p10) target bundleno = 26 (0x1a), region = 33  ;;  %s376_s27 = sld [smem:[#allocation5 + $0x1]] (%p24_p10)  ;;  %vm208_vm11 = vcmask (%p24_p10), 1041408   ;;  %vm210_vm12 = vcmask (%p24_p10), 1042432   ;;  %vm212_vm13 = vcmask (%p24_p10), 1043456   ;;  %vm214_vm14 = vcmask (%p24_p10), 1044480  }
  0x1f   :  { %s378_s28 = sld [smem:[#allocation5 + $0x2]] (%p24_p10)  ;;  %v401_v5 = vshrl.u32 (%p24_p10), %v43_v2, 7  ;;  %vm216_vm15 = vcmask (%p24_p10), 1045504  }
  0x20   : > { %s30_s24 = scalar_lea.vmem %s447_s2, %s29_s21  ;;  %s380_s29 = sld [smem:[#allocation5 + $0x3]] (%p24_p10) }
  0x21   : > { %v31_v0 = vld [vmem:[%s30_s24] sm:$0x1]  ;;  %s382_s30 = sld [smem:[#allocation5 + $0x4]] (%p24_p10)  ;;  %s227_s21 = sshll.u32 (%p24_p10), %s344_s1, 4  ;;  %s228_s21 = int_to_ptr.vmem [resolvable:$true] %s227_s21 }
  0x22   : > { %34 = vst.msk [vmem:[%s32_s25] sm:$0x1] %vm33_vm0, %v31_v0  ;;  %s384_s4 = sld [smem:[#allocation5 + $0x5]] (%p24_p10)  ;;  %vm218_vm0 = vcmask (%p24_p10), 1046528   ;;  %s309_s22 = scalar_lea.vmem (%p24_p10), %s228_s21, 128 }
  0x23   :  { %p47_p11 = scmp.gt.s32.totalorder %s374_s26, 1  ;;  %s387_s2 = sld [smem:[#allocation5 + $0x6]]  ;;  %v50_v7 = vstv %s374_s26 }
  0x24   :  { %p68_p12 = scmp.gt.s32.totalorder %s376_s27, 1  ;;  %s390_s5 = sld [smem:[#allocation5 + $0x7]]  ;;  %v71_v8 = vstv %s376_s27  ;;  %vm51_vm1 = vcmp.lt.s32.totalorder %v401_v5, %v50_v7 }
  0x25   :  { %s48_s6 = scalar_select %p47_p11, %s374_s26, 1  ;;  %vm72_vm2 = vcmp.lt.s32.totalorder %v401_v5, %v71_v8  ;;  %v91_v11 = vstv %s378_s28  ;;  %v242_v14 = vsel %vm51_vm1, 1.0, %v343_v13 }
  0x26   :  { %s69_s7 = scalar_select %p68_p12, %s376_s27, 1  ;;  %v111_v12 = vstv %s380_s29  ;;  %v244_v15 = vsel %vm72_vm2, 1.0, %v343_v13  ;;  %vm92_vm3 = vcmp.lt.s32.totalorder %v401_v5, %v91_v11 }
  0x27   :  { %s49_s8 = scvt.s32.f32 %s48_s6  ;;  %p88_p13 = scmp.gt.s32.totalorder %s378_s28, 1  ;;  %v131_v17 = vstv %s382_s30  ;;  %vm112_vm4 = vcmp.lt.s32.totalorder %v401_v5, %v111_v12  ;;  %v246_v26 = vsel %vm92_vm3, 1.0, %v343_v13 }
  0x28   :  { %s70_s9 = scvt.s32.f32 %s69_s7  ;;  %p108_p0 = scmp.gt.s32.totalorder %s380_s29, 1  ;;  %v151_v24 = vstv %s384_s4  ;;  %vm132_vm6 = vcmp.lt.s32.totalorder %v401_v5, %v131_v17  ;;  %v248_v29 = vsel %vm112_vm4, 1.0, %v343_v13 }
  0x29   :  { %v54_v1 = vstv %s49_s8  ;;  %s89_s10 = scalar_select %p88_p13, %s378_s28, 1  ;;  %v35_v20 = vld [vmem:[#allocation2] sm:$0xff]  ;;  %v36_v22 = vld [vmem:[#allocation2 + $0x8] sm:$0xff]  ;;  %v171_v27 = vstv %s387_s2  ;;  %v37_v31 = vld [vmem:[#allocation2 + $0x10] sm:$0xff]  ;;  %vm152_vm7 = vcmp.lt.s32.totalorder %v401_v5, %v151_v24  ;;  %v250_v37 = vsel %vm132_vm6, 1.0, %v343_v13 }
  0x2a   :  { %269 = vrcp.f32 %v54_v1  ;;  %v75_v3 = vstv %s70_s9  ;;  %s109_s11 = scalar_select %p108_p0, %s380_s29, 1  ;;  %v38_v34 = vld [vmem:[#allocation2 + $0x18] sm:$0xff]  ;;  %vm172_vm8 = vcmp.lt.s32.totalorder %v401_v5, %v171_v27  ;;  %v191_v41 = vstv %s390_s5  ;;  %v39_v46 = vld [vmem:[#allocation2 + $0x20] sm:$0xff]  ;;  %v40_v51 = vld [vmem:[#allocation2 + $0x28] sm:$0xff] }
  0x2b   :  { %271 = vrcp.f32 %v75_v3  ;;  %s90_s12 = scvt.s32.f32 %s89_s10  ;;  %p128_p1 = scmp.gt.s32.totalorder %s382_s30, 1  ;;  %v252_v44 = vsel %vm152_vm7, 1.0, %v343_v13  ;;  %v254_v49 = vsel %vm172_vm8, 1.0, %v343_v13  ;;  %vm192_vm10 = vcmp.lt.s32.totalorder %v401_v5, %v191_v41  ;;  %v41_v63 = vld [vmem:[#allocation2 + $0x30] sm:$0xff] }
  0x2c   :  { %s110_s13 = scvt.s32.f32 %s109_s11  ;;  %p148_p2 = scmp.gt.s32.totalorder %s384_s4, 1  ;;  %v256_v3 = vsel %vm192_vm10, 1.0, %v343_v13 }
  0x2d   :  { %v95_v4 = vstv %s90_s12  ;;  %s129_s14 = scalar_select %p128_p1, %s382_s30, 1 }
  0x2e   :  { %273 = vrcp.f32 %v95_v4  ;;  %v115_v6 = vstv %s110_s13  ;;  %s149_s15 = scalar_select %p148_p2, %s384_s4, 1 }
  0x2f   :  { %275 = vrcp.f32 %v115_v6  ;;  %s130_s16 = scvt.s32.f32 %s129_s14  ;;  %p168_p3 = scmp.gt.s32.totalorder %s387_s2, 1 }
  0x30   :  { %s150_s17 = scvt.s32.f32 %s149_s15  ;;  %p188_p4 = scmp.gt.s32.totalorder %s390_s5, 1 }
  0x31   :  { %v135_v9 = vstv %s130_s16  ;;  %s169_s18 = scalar_select %p168_p3, %s387_s2, 1 }
  0x32   :  { %277 = vrcp.f32 %v135_v9  ;;  %v155_v10 = vstv %s150_s17  ;;  %s189_s19 = scalar_select %p188_p4, %s390_s5, 1 }
  0x33   :  { %279 = vrcp.f32 %v155_v10  ;;  %s170_s20 = scvt.s32.f32 %s169_s18  ;;  %p310_p5 = scmp.ne.s32.totalorder %s228_s21, %s309_s22 }
  0x34   :  { %s190_s0 = scvt.s32.f32 %s189_s19  ;;  %p314_p6 = scmp.lt.s32.totalorder %s228_s21, %s228_s21 }
  0x35   :  { %v175_v16 = vstv %s170_s20  ;;  %p315_p7 = scmp.lt.s32.totalorder %s309_s22, %s309_s22 }
  0x36   :  { %281 = vrcp.f32 %v175_v16  ;;  %v195_v18 = vstv %s190_s0 }
  0x37   :  { %v270_v19 = vpop.eup %269  ;;  %283 = vrcp.f32 %v195_v18  ;;  %p316_p8 = por %p315_p7, %p314_p6 }
  0x38   :  { %v272_v21 = vpop.eup %271  ;;  %v56_v23 = vmul.f32 %v270_v19, %v242_v14  ;;  %v42_v14 = vld [vmem:[#allocation2 + $0x38] sm:$0xff] }
  0x39   :  { %v77_v25 = vmul.f32 %v272_v21, %v244_v15  ;;  %p317_p9 = pnand %p316_p8, %p310_p5 }
  0x3a   :  { %v57_v28 = vmul.f32 %v56_v23, %v35_v20 }
  0x3b   :  { %v274_v30 = vpop.eup %273  ;;  %v78_v32 = vmul.f32 %v77_v25, %v36_v22 }
  0x3c   :  { %v276_v33 = vpop.eup %275  ;;  %v59_v35 = vsel %vm58_vm5, %v57_v28, 0.0  ;;  %v97_v36 = vmul.f32 %v274_v30, %v246_v26 }
  0x3d   :  { %v60_v38 = vrot.slane %v59_v35, 4  ;;  %v79_v39 = vsel %vm58_vm5, %v78_v32, 0.0  ;;  %v117_v40 = vmul.f32 %v276_v33, %v248_v29 }
  0x3e   :  { %v80_v42 = vrot.slane %v79_v39, 4  ;;  %v98_v43 = vmul.f32 %v97_v36, %v37_v31 }
  0x3f   :  { %v278_v45 = vpop.eup %277  ;;  %v61_v47 = vadd.f32 %v60_v38, %v59_v35  ;;  %v118_v48 = vmul.f32 %v117_v40, %v38_v34 }
  0x40   :  { %v280_v50 = vpop.eup %279  ;;  %v81_v52 = vadd.f32 %v80_v42, %v79_v39  ;;  %v99_v53 = vsel %vm58_vm5, %v98_v43, 0.0  ;;  %v137_v54 = vmul.f32 %v278_v45, %v250_v37 }
  0x41   :  { %v62_v55 = vrot.slane %v61_v47, 2  ;;  %v100_v56 = vrot.slane %v99_v53, 4  ;;  %v119_v57 = vsel %vm58_vm5, %v118_v48, 0.0  ;;  %v157_v58 = vmul.f32 %v280_v50, %v252_v44 }
  0x42   :  { %v82_v59 = vrot.slane %v81_v52, 2  ;;  %v120_v60 = vrot.slane %v119_v57, 4  ;;  %v138_v61 = vmul.f32 %v137_v54, %v39_v46 }
  0x43   :  { %v282_v62 = vpop.eup %281  ;;  %v63_v0 = vadd.f32 %v62_v55, %v61_v47  ;;  %v101_v1 = vadd.f32 %v100_v56, %v99_v53  ;;  %v158_v2 = vmul.f32 %v157_v58, %v40_v51 }
  0x44   :  { %v284_v4 = vpop.eup %283  ;;  %v83_v6 = vadd.f32 %v82_v59, %v81_v52  ;;  %v121_v7 = vadd.f32 %v120_v60, %v119_v57  ;;  %v139_v5 = vsel %vm58_vm5, %v138_v61, 0.0  ;;  %v177_v8 = vmul.f32 %v282_v62, %v254_v49 }
  0x45   :  { %v64_v9 = vrot.slane %v63_v0, 1  ;;  %v102_v10 = vrot.slane %v101_v1, 2  ;;  %v140_v11 = vrot.slane %v139_v5, 4  ;;  %v159_v12 = vsel %vm58_vm5, %v158_v2, 0.0 }
  0x46   :  { %v84_v15 = vrot.slane %v83_v6, 1  ;;  %v122_v16 = vrot.slane %v121_v7, 2  ;;  %v160_v17 = vrot.slane %v159_v12, 4  ;;  %v178_v18 = vmul.f32 %v177_v8, %v41_v63 }
  0x47   :  { %v65_v19 = vadd.f32 %v64_v9, %v63_v0  ;;  %v103_v20 = vadd.f32 %v102_v10, %v101_v1  ;;  %v141_v21 = vadd.f32 %v140_v11, %v139_v5  ;;  %v197_v13 = vmul.f32 %v284_v4, %v256_v3 }
  0x48   :  { %v85_v22 = vadd.f32 %v84_v15, %v83_v6  ;;  %v123_v23 = vadd.f32 %v122_v16, %v121_v7  ;;  %v161_v24 = vadd.f32 %v160_v17, %v159_v12  ;;  %v179_v25 = vsel %vm58_vm5, %v178_v18, 0.0 }
  0x49   :  { %v104_v26 = vrot.slane %v103_v20, 1  ;;  %v142_v27 = vrot.slane %v141_v21, 2  ;;  %v180_v28 = vrot.slane %v179_v25, 4  ;;  %v198_v29 = vmul.f32 %v197_v13, %v42_v14 }
  0x4a   :  { %v124_v30 = vrot.slane %v123_v23, 1  ;;  %v162_v31 = vrot.slane %v161_v24, 2  ;;  %v207_v32 = vsel %vm206_vm9, %v65_v19, %v85_v22 }
  0x4b   :  { %v105_v33 = vadd.f32 %v104_v26, %v103_v20  ;;  %v143_v34 = vadd.f32 %v142_v27, %v141_v21  ;;  %v181_v35 = vadd.f32 %v180_v28, %v179_v25  ;;  %v199_v36 = vsel %vm58_vm5, %v198_v29, 0.0 }
  0x4c   :  { %v125_v37 = vadd.f32 %v124_v30, %v123_v23  ;;  %v163_v38 = vadd.f32 %v162_v31, %v161_v24  ;;  %v200_v39 = vrot.slane %v199_v36, 4 }
  0x4d   :  { %v144_v40 = vrot.slane %v143_v34, 1  ;;  %v182_v41 = vrot.slane %v181_v35, 2  ;;  %v209_v42 = vsel %vm208_vm11, %v207_v32, %v105_v33 }
  0x4e   :  { %v164_v43 = vrot.slane %v163_v38, 1  ;;  %v201_v44 = vadd.f32 %v200_v39, %v199_v36  ;;  %v211_v45 = vsel %vm210_vm12, %v209_v42, %v125_v37 }
  0x4f   :  { %v145_v46 = vadd.f32 %v144_v40, %v143_v34  ;;  %v183_v47 = vadd.f32 %v182_v41, %v181_v35 }
  0x50   :  { %v165_v48 = vadd.f32 %v164_v43, %v163_v38  ;;  %v202_v49 = vrot.slane %v201_v44, 2 }
  0x51   :  { %v184_v50 = vrot.slane %v183_v47, 1  ;;  %v213_v51 = vsel %vm212_vm13, %v211_v45, %v145_v46 }
  0x52   :  { %v203_v52 = vadd.f32 %v202_v49, %v201_v44  ;;  %v215_v53 = vsel %vm214_vm14, %v213_v51, %v165_v48 }
  0x53   :  { %v185_v54 = vadd.f32 %v184_v50, %v183_v47 }
  0x54   :  { %v204_v55 = vrot.slane %v203_v52, 1 }
  0x55   :  { %v217_v56 = vsel %vm216_vm15, %v215_v53, %v185_v54 }
  0x56   :  { %v205_v57 = vadd.f32 %v204_v55, %v203_v52 }
  0x58   :  { %v219_v58 = vsel %vm218_vm0, %v217_v56, %v205_v57 }
  0x59   :  { %220 = vst.msk [vmem:[#allocation6] sm:$0xff] %vm58_vm5, %v219_v58 }
  0x5a   :  { %320 = shalt.err (!%p317_p9)
}
  0x5b   :  { %230 = dma.vmem_to_hbm [thread:$0]  %s228_s21, 128, %s448_s3, [#allocation7]  }
  0x5c   :  { %335 = dma.done.wait [#allocation7], 128  }
  0x5d   :  { %336 = vsyncadd [#allocation7], 4294967168 }
  0x5e   :  { %234 = vsyncpa [#allocation7], 1 }

</bundles_post_ra>
